<compile_context>
chip_gen: v6e
topology: v6e:2x2x1
jax: 0.10.0
libtpu: 0.0.40
codegen_flags: <defaults>
</compile_context>

<pallas_src>
import functools

import jax
import jax.numpy as jnp
from jax import lax
from jax.experimental import pallas as pl
from jax.experimental.pallas import tpu as pltpu


def _interactive_attn_kernel(z_ref, w_ref, b_ref, o_ref, q_scr, acc_ref, *, q_tile):
    bb, S, H = z_ref.shape
    nq = S // q_tile
    inv_s = 1.0 / float(S)

    # ---- fused QKV projection: one bf16 MXU pass over the whole batch block ----
    # (collapsing (bb, S) is layout-free when S is a sublane multiple; production
    #  S=512 is aligned, the toy S=8 only pays a tiny relayout copy.)
    z2 = z_ref[...].reshape(bb * S, H)                                    # bf16
    qkv = jnp.dot(z2, w_ref[...],
                  preferred_element_type=jnp.float32) + b_ref[...]       # (bb*S, 3H) f32

    # 1/sqrt(H) is folded into the q columns of W/b host-side -> no in-kernel scale.
    q_scr[...] = qkv[:, 0:H].astype(jnp.bfloat16).reshape(bb, S, H)
    k = qkv[:, H:2 * H].astype(jnp.bfloat16).reshape(bb, S, H)
    v = qkv[:, 2 * H:3 * H].astype(jnp.bfloat16).reshape(bb, S, H)

    # mean-over-queries accumulator: scratch persists across grid steps -> zero it.
    acc_ref[...] = jnp.zeros_like(acc_ref)

    # ---- query-tile loop: bounds the live range of the (tq, S) score block -----
    @pl.loop(0, nq)
    def _(t):
        i0 = pl.multiple_of(t * q_tile, q_tile)
        q_t = q_scr[:, pl.ds(i0, q_tile), :]                             # (bb, tq, H) bf16

        # scores[b, i, j] = q[b, i, :] . k[b, j, :]
        # TODO(synk): check the Mosaic bundle for a vxpose from contracting k's
        # lane dim at production S; restructure k's layout only if it shows up
        # on the critical path.
        s_t = lax.dot_general(q_t, k,
                              dimension_numbers=(((2,), (2,)), ((0,), (0,))),
                              preferred_element_type=jnp.float32)        # (bb, tq, S) f32

        # numerically stable softmax pieces, kept in f32 (v5e: no bf16 VPU/EUP).
        m = jnp.max(s_t, axis=-1, keepdims=True)
        e = jnp.exp(s_t - m)
        r = pl.reciprocal(jnp.sum(e, axis=-1, keepdims=True),
                          approx=True) * inv_s                           # (bb, tq, 1) f32

        # mean over queries folded into an MXU mat-vec (never materializes the
        # normalized (S, S) weights):  acc[b, 0, j] += sum_i r[b, i] * e[b, i, j]
        acc_ref[...] += lax.dot_general(
            r.astype(jnp.bfloat16), e.astype(jnp.bfloat16),
            dimension_numbers=(((1,), (1,)), ((0,), (0,))),
            preferred_element_type=jnp.float32)                          # (bb, 1, S)

    # ---- (1, S) @ (S, H) value mat-vec, then one lane-dense (bb, H) store ------
    out = lax.dot_general(acc_ref[...].astype(jnp.bfloat16), v,
                          dimension_numbers=(((2,), (1,)), ((0,), (0,))),
                          preferred_element_type=jnp.float32)            # (bb, 1, H)
    o_ref[...] = out[:, 0, :].astype(o_ref.dtype)


def fuse_qkv_params(wq, bq, wk, bk, wv, bv):
    """Host-side, one-time parameter fusion (not a per-call wrapper op):
    fold 1/sqrt(H) into the q projection and concatenate the three torch-layout
    (H, H) Linear weights into one pre-transposed (H, 3H) bf16 matrix and a
    (1, 3H) f32 bias."""
    H = wq.shape[0]
    inv_scale = 1.0 / (float(H) ** 0.5)
    w_qkv_t = jnp.concatenate([(wq * inv_scale).T, wk.T, wv.T], axis=1)   # (H, 3H)
    b_qkv = jnp.concatenate([bq * inv_scale, bk, bv], axis=1)             # (1, 3H)
    return w_qkv_t.astype(jnp.bfloat16), b_qkv.astype(jnp.float32)


def _vmem_limit_bytes(bb, S, H, q_tile):
    bf16, f32 = 2, 4
    est = (
        2 * bb * S * H * bf16            # z block (double-buffered)
        + 2 * H * 3 * H * bf16           # fused W_qkv^T (double-buffered)
        + 2 * 3 * H * f32                # fused bias
        + 2 * bb * H * f32               # output block
        + bb * S * 3 * H * f32           # qkv f32 intermediate
        + 2 * bb * S * H * bf16          # k, v bf16 values
        + bb * S * H * bf16              # q scratch
        + bb * S * f32                   # mean-over-queries accumulator
        + 2 * bb * q_tile * S * f32      # per-tile scores + exp
    )
    # 2x headroom for compiler temporaries; clamp to v7x's 64 MiB physical VMEM.
    return int(min(64 * 1024 * 1024, max(32 * 1024 * 1024, 2 * est)))


def interactive_attention(z, w_qkv_t, b_qkv, *, batch_blocks=1, q_tile=None):
    """z: (B, S, H) last_hidden_state; w_qkv_t: (H, 3H) fused, scale-folded weight;
    b_qkv: (1, 3H) fused bias. Returns (B, H) f32.

    batch_blocks: grid steps over the batch. Use >= 2 on v7x (two TensorCores)
    and for real batches so the z HBM fetch pipelines behind compute.
    q_tile: query-row tile bounding the live (q_tile, S) score block
    (256 suits v6e/v7x at S=512; 128 suits v5e)."""
    B, S, H = z.shape
    assert B % batch_blocks == 0, "batch must divide evenly into batch_blocks"
    bb = B // batch_blocks
    if q_tile is None:
        q_tile = S if S <= 256 else 256
    assert S % q_tile == 0, "sequence length must be a multiple of q_tile"

    # bf16 MXU operands (halves HBM traffic / VMEM footprint); bias stays f32.
    z = z.astype(jnp.bfloat16)
    w_qkv_t = w_qkv_t.astype(jnp.bfloat16)
    b_qkv = b_qkv.astype(jnp.float32)

    kernel = functools.partial(_interactive_attn_kernel, q_tile=q_tile)

    return pl.pallas_call(
        kernel,
        out_shape=jax.ShapeDtypeStruct((B, H), jnp.float32),
        grid_spec=pltpu.PrefetchScalarGridSpec(
            num_scalar_prefetch=0,
            grid=(batch_blocks,),
            in_specs=[
                pl.BlockSpec((bb, S, H), lambda i: (i, 0, 0)),        # z block
                pl.BlockSpec((H, 3 * H), lambda i: (0, 0)),           # fused W_qkv^T
                pl.BlockSpec((1, 3 * H), lambda i: (0, 0)),           # fused bias
            ],
            out_specs=pl.BlockSpec((bb, H), lambda i: (i, 0)),
            scratch_shapes=[
                pltpu.VMEM((bb, S, H), jnp.bfloat16),   # scaled q (sliced per tile)
                pltpu.VMEM((bb, 1, S), jnp.float32),    # mean-over-queries acc
            ],
        ),
        compiler_params=pltpu.CompilerParams(
            dimension_semantics=("parallel",),
            vmem_limit_bytes=_vmem_limit_bytes(bb, S, H, q_tile),
        ),
    )(z, w_qkv_t, b_qkv)


def reference(z, wq, bq, wk, bk, wv, bv):
    """Pure-JAX f32 reference mirroring the torch forward (after BERT)."""
    H = z.shape[-1]
    q = z @ wq.T + bq
    k = z @ wk.T + bk
    v = z @ wv.T + bv
    scores = jnp.einsum("bqh,bkh->bqk", q, k) / (H ** 0.5)
    w = jax.nn.softmax(scores, axis=-1)
    z_new = jnp.einsum("bqk,bkh->bqh", w, v)
    return z_new.mean(axis=1)


if __name__ == "__main__":
    B, S, H = 2, 8, 32       # small shapes consistent with (input_ids -> BERT -> (B, S, H))
    VOCAB = 100

    key = jax.random.PRNGKey(0)
    k_ids, k_emb, k_wq, k_wk, k_wv, k_bq, k_bk, k_bv = jax.random.split(key, 8)

    # Synthetic "tokenized" inputs.
    input_ids = jax.random.randint(k_ids, (B, S), 0, VOCAB, dtype=jnp.int32)
    attention_mask = jnp.ones((B, S), dtype=jnp.int32)   # unused by the head (as in torch)

    # TODO(synk): deterministic stand-in for the pretrained BERT backbone.
    embedding = 0.02 * jax.random.normal(k_emb, (VOCAB, H), dtype=jnp.float32)
    z = embedding[input_ids]                              # (B, S, H) "last_hidden_state"

    # Deterministic linear-layer parameters (nn.Linear(H, H) each, torch layout).
    wq = 0.02 * jax.random.normal(k_wq, (H, H), dtype=jnp.float32)
    wk = 0.02 * jax.random.normal(k_wk, (H, H), dtype=jnp.float32)
    wv = 0.02 * jax.random.normal(k_wv, (H, H), dtype=jnp.float32)
    bq = 0.01 * jax.random.normal(k_bq, (1, H), dtype=jnp.float32)
    bk = 0.01 * jax.random.normal(k_bk, (1, H), dtype=jnp.float32)
    bv = 0.01 * jax.random.normal(k_bv, (1, H), dtype=jnp.float32)

    # Host-side, one-time fusion + 1/sqrt(H) fold + bf16 cast of the MXU weight.
    w_qkv_t, b_qkv = fuse_qkv_params(wq, bq, wk, bk, wv, bv)

    out = interactive_attention(z, w_qkv_t, b_qkv, batch_blocks=1)
    out = jax.block_until_ready(out)

    ref = reference(z, wq, bq, wk, bk, wv, bv)
    assert out.shape == (B, H), out.shape
    # Tolerance accounts for bf16 MXU operands + approx reciprocal in the softmax.
    assert jnp.allclose(out, ref, atol=2e-3, rtol=2e-2), "mismatch vs f32 reference"

    print("KERNEL_OK")
</pallas_src>

<mosaic_0001>
module attributes {stable_mosaic.version = 11 : i64} {
  func.func @_interactive_attn_kernel(%arg0: i32, %arg1: memref<2x8x32xbf16, #tpu.memory_space<vmem>>, %arg2: memref<32x96xbf16, #tpu.memory_space<vmem>>, %arg3: memref<1x96xf32, #tpu.memory_space<vmem>>, %arg4: memref<2x32xf32, #tpu.memory_space<vmem>>, %arg5: memref<2x8x32xbf16, #tpu.memory_space<vmem>>, %arg6: memref<2x1x8xf32, #tpu.memory_space<vmem>>) attributes {dimension_semantics = [#tpu.dimension_semantics<parallel>], iteration_bounds = array<i64: 1>, scalar_prefetch = 0 : i64, scratch_operands = 2 : i64, tpu.core_type = #tpu.core_type<tc>, window_params = [{transform_indices = @transform_0, window_bounds = array<i64: 2, 8, 32>}, {pipeline_mode = #tpu.pipeline_mode<synchronous>, transform_indices = @transform_1, window_bounds = array<i64: 32, 96>}, {pipeline_mode = #tpu.pipeline_mode<synchronous>, transform_indices = @transform_2, window_bounds = array<i64: 1, 96>}, {transform_indices = @transform_3, window_bounds = array<i64: 2, 32>}]} {
    %c0 = arith.constant 0 : index
    %c0_0 = arith.constant 0 : index
    %c0_1 = arith.constant 0 : index
    %0 = vector.load %arg1[%c0, %c0_0, %c0_1] : memref<2x8x32xbf16, #tpu.memory_space<vmem>>, vector<2x8x32xbf16>
    %1 = vector.shape_cast %0 : vector<2x8x32xbf16> to vector<16x32xbf16>
    %c0_2 = arith.constant 0 : index
    %c0_3 = arith.constant 0 : index
    %2 = vector.load %arg2[%c0_2, %c0_3] : memref<32x96xbf16, #tpu.memory_space<vmem>>, vector<32x96xbf16>
    %cst = arith.constant dense<0.000000e+00> : vector<16x96xf32>
    %3 = tpu.matmul %1, %2, %cst {dimension_numbers = #tpu.dot_dimension_numbers<[1], [0], [0], [1], [0, 0, 1, 1], [], []>} : vector<16x32xbf16>, vector<32x96xbf16>, vector<16x96xf32> -> vector<16x96xf32>
    %c0_4 = arith.constant 0 : index
    %c0_5 = arith.constant 0 : index
    %4 = vector.load %arg3[%c0_4, %c0_5] : memref<1x96xf32, #tpu.memory_space<vmem>>, vector<1x96xf32>
    %5 = vector.broadcast %4 : vector<1x96xf32> to vector<16x96xf32>
    %6 = arith.addf %3, %5 : vector<16x96xf32>
    %7 = vector.extract_strided_slice %6 {offsets = [0, 0], sizes = [16, 32], strides = [1, 1]} : vector<16x96xf32> to vector<16x32xf32>
    %8 = arith.truncf %7 : vector<16x32xf32> to vector<16x32xbf16>
    %9 = vector.shape_cast %8 : vector<16x32xbf16> to vector<2x8x32xbf16>
    %c0_6 = arith.constant 0 : index
    %c0_7 = arith.constant 0 : index
    %c0_8 = arith.constant 0 : index
    %10 = vector.load %arg5[%c0_6, %c0_7, %c0_8] : memref<2x8x32xbf16, #tpu.memory_space<vmem>>, vector<2x8x32xbf16>
    tpu.vector_store %arg5[%c0_6, %c0_7, %c0_8], %9 {strides = array<i32>} : memref<2x8x32xbf16, #tpu.memory_space<vmem>>, vector<2x8x32xbf16>,
    %11 = vector.extract_strided_slice %6 {offsets = [0, 32], sizes = [16, 32], strides = [1, 1]} : vector<16x96xf32> to vector<16x32xf32>
    %12 = arith.truncf %11 : vector<16x32xf32> to vector<16x32xbf16>
    %13 = vector.shape_cast %12 : vector<16x32xbf16> to vector<2x8x32xbf16>
    %14 = vector.extract_strided_slice %6 {offsets = [0, 64], sizes = [16, 32], strides = [1, 1]} : vector<16x96xf32> to vector<16x32xf32>
    %15 = arith.truncf %14 : vector<16x32xf32> to vector<16x32xbf16>
    %16 = vector.shape_cast %15 : vector<16x32xbf16> to vector<2x8x32xbf16>
    %cst_9 = arith.constant 0.000000e+00 : f32
    %17 = vector.broadcast %cst_9 : f32 to vector<2x1x8xf32>
    %c0_10 = arith.constant 0 : index
    %c0_11 = arith.constant 0 : index
    %c0_12 = arith.constant 0 : index
    %18 = vector.load %arg6[%c0_10, %c0_11, %c0_12] : memref<2x1x8xf32, #tpu.memory_space<vmem>>, vector<2x1x8xf32>
    tpu.vector_store %arg6[%c0_10, %c0_11, %c0_12], %17 {strides = array<i32>} : memref<2x1x8xf32, #tpu.memory_space<vmem>>, vector<2x1x8xf32>,
    %c0_i32 = arith.constant 0 : i32
    %c1_i32 = arith.constant 1 : i32
    %19 = arith.muli %c0_i32, %c1_i32 : i32
    %c0_i32_13 = arith.constant 0 : i32
    %20 = arith.addi %c0_i32_13, %19 : i32
    %c8_i32 = arith.constant 8 : i32
    %21 = arith.muli %20, %c8_i32 : i32
    %22 = tpu.assume_multiple %21, 8 : i32
    %c0_14 = arith.constant 0 : index
    %23 = arith.index_cast %22 : i32 to index
    %c0_15 = arith.constant 0 : index
    %24 = vector.load %arg5[%c0_14, %23, %c0_15] : memref<2x8x32xbf16, #tpu.memory_space<vmem>>, vector<2x8x32xbf16>
    %cst_16 = arith.constant dense<0.000000e+00> : vector<2x8x8xf32>
    %25 = tpu.matmul %24, %13, %cst_16 {dimension_numbers = #tpu.dot_dimension_numbers<[2], [2], [1], [1], [0, 0, 0, 1, 1, 1], [0], [0]>} : vector<2x8x32xbf16>, vector<2x8x32xbf16>, vector<2x8x8xf32> -> vector<2x8x8xf32>
    %cst_17 = arith.constant dense<0xFF800000> : vector<2x8xf32>
    %26 = vector.multi_reduction <maximumf>, %25, %cst_17 [2] : vector<2x8x8xf32> to vector<2x8xf32>
    %27 = vector.shape_cast %26 : vector<2x8xf32> to vector<2x8x1xf32>
    %28 = vector.broadcast %27 : vector<2x8x1xf32> to vector<2x8x8xf32>
    %29 = arith.subf %25, %28 : vector<2x8x8xf32>
    %30 = math.exp %29 : vector<2x8x8xf32>
    %cst_18 = arith.constant dense<0.000000e+00> : vector<2x8xf32>
    %31 = vector.multi_reduction <add>, %30, %cst_18 [2] : vector<2x8x8xf32> to vector<2x8xf32>
    %32 = vector.shape_cast %31 : vector<2x8xf32> to vector<2x8x1xf32>
    %33 = tpu.reciprocal %32 {approx = true} : vector<2x8x1xf32> -> vector<2x8x1xf32>
    %cst_19 = arith.constant 1.250000e-01 : f32
    %34 = vector.broadcast %cst_19 : f32 to vector<2x8x1xf32>
    %35 = arith.mulf %33, %34 : vector<2x8x1xf32>
    %c0_20 = arith.constant 0 : index
    %c0_21 = arith.constant 0 : index
    %c0_22 = arith.constant 0 : index
    %36 = vector.load %arg6[%c0_20, %c0_21, %c0_22] : memref<2x1x8xf32, #tpu.memory_space<vmem>>, vector<2x1x8xf32>
    %37 = arith.truncf %35 : vector<2x8x1xf32> to vector<2x8x1xbf16>
    %38 = arith.truncf %30 : vector<2x8x8xf32> to vector<2x8x8xbf16>
    %cst_23 = arith.constant dense<0.000000e+00> : vector<2x1x8xf32>
    %39 = tpu.matmul %37, %38, %cst_23 {dimension_numbers = #tpu.dot_dimension_numbers<[1], [1], [2], [2], [0, 0, 0, 2, 1, 2], [0], [0]>} : vector<2x8x1xbf16>, vector<2x8x8xbf16>, vector<2x1x8xf32> -> vector<2x1x8xf32>
    %40 = arith.addf %36, %39 : vector<2x1x8xf32>
    %c0_24 = arith.constant 0 : index
    %c0_25 = arith.constant 0 : index
    %c0_26 = arith.constant 0 : index
    %41 = vector.load %arg6[%c0_24, %c0_25, %c0_26] : memref<2x1x8xf32, #tpu.memory_space<vmem>>, vector<2x1x8xf32>
    tpu.vector_store %arg6[%c0_24, %c0_25, %c0_26], %40 {strides = array<i32>} : memref<2x1x8xf32, #tpu.memory_space<vmem>>, vector<2x1x8xf32>,
    %c1_i32_27 = arith.constant 1 : i32
    %c0_28 = arith.constant 0 : index
    %c0_29 = arith.constant 0 : index
    %c0_30 = arith.constant 0 : index
    %42 = vector.load %arg6[%c0_28, %c0_29, %c0_30] : memref<2x1x8xf32, #tpu.memory_space<vmem>>, vector<2x1x8xf32>
    %43 = arith.truncf %42 : vector<2x1x8xf32> to vector<2x1x8xbf16>
    %cst_31 = arith.constant dense<0.000000e+00> : vector<2x1x32xf32>
    %44 = tpu.matmul %43, %16, %cst_31 {dimension_numbers = #tpu.dot_dimension_numbers<[2], [1], [1], [2], [0, 0, 0, 1, 1, 2], [0], [0]>} : vector<2x1x8xbf16>, vector<2x8x32xbf16>, vector<2x1x32xf32> -> vector<2x1x32xf32>
    %45 = vector.shape_cast %44 : vector<2x1x32xf32> to vector<2x32xf32>
    %c0_32 = arith.constant 0 : index
    %c0_33 = arith.constant 0 : index
    %46 = vector.load %arg4[%c0_32, %c0_33] : memref<2x32xf32, #tpu.memory_space<vmem>>, vector<2x32xf32>
    tpu.vector_store %arg4[%c0_32, %c0_33], %45 {strides = array<i32>} : memref<2x32xf32, #tpu.memory_space<vmem>>, vector<2x32xf32>,
    return
  }
  func.func @transform_0(%arg0: i32) -> (i32, i32, i32) {
    %c0_i32 = arith.constant 0 : i32
    %c0_i32_0 = arith.constant 0 : i32
    %c0_i32_1 = arith.constant 0 : i32
    return %arg0, %c0_i32, %c0_i32_0 : i32, i32, i32
  }
  func.func @transform_1(%arg0: i32) -> (i32, i32) {
    %c0_i32 = arith.constant 0 : i32
    %c0_i32_0 = arith.constant 0 : i32
    %c0_i32_1 = arith.constant 0 : i32
    return %c0_i32, %c0_i32_0 : i32, i32
  }
  func.func @transform_2(%arg0: i32) -> (i32, i32) {
    %c0_i32 = arith.constant 0 : i32
    %c0_i32_0 = arith.constant 0 : i32
    %c0_i32_1 = arith.constant 0 : i32
    return %c0_i32, %c0_i32_0 : i32, i32
  }
  func.func @transform_3(%arg0: i32) -> (i32, i32) {
    %c0_i32 = arith.constant 0 : i32
    %c0_i32_0 = arith.constant 0 : i32
    return %arg0, %c0_i32 : i32, i32
  }
}

</mosaic_0001>

<bundles_post_ra>
// kernel: tpu_custom_call.1
= control target key start
LH: loop header
LB: loop body
LE: loop exit
PB: predicated region body
PF: predicated region fallthrough
CT: control target
= control target key end

     0   :  { %8 = vsyncpa [#allocation5], 0  ;;  %s774_s0 = inlined_call_operand.hbm [shape: bf16[2,8,32], index: 0, kind: input, shape index: {}]   ;;  %s775_s1 = inlined_call_operand.hbm [shape: bf16[32,96], index: 1, kind: input, shape index: {}]   ;;  %s776_s2 = inlined_call_operand.vmem [shape: f32[1,96], index: 2, kind: input, shape index: {}]   ;;  %s777_s3 = inlined_call_operand.hbm [shape: f32[2,32], index: 3, kind: output, shape index: {}]  }
   0x1   :  { %9 = vsyncpa [#allocation8], 0 }
   0x2   :  { %10 = vsyncpa [#allocation6], 0  ;;  %s673_s12 = smov [#allocation4]  }
   0x3   :  { %s16_s13 = sshll.u32 %s673_s12, 4  ;;  %s17_s13 = int_to_ptr.vmem [resolvable:$true] %s16_s13 }
   0x4   :  { %s615_s14 = scalar_lea.vmem %s17_s13, 128  ;;  %p620_p1 = scmp.lt.s32.totalorder %s17_s13, %s17_s13 }
   0x5   :  { %p616_p0 = scmp.ne.s32.totalorder %s17_s13, %s615_s14  ;;  %p621_p2 = scmp.lt.s32.totalorder %s615_s14, %s615_s14 }
   0x7   :  { %p622_p3 = por %p621_p2, %p620_p1 }
   0x9   :  { %p623_p4 = pnand %p622_p3, %p616_p0 }
   0xb   :  { %626 = shalt.err (!%p623_p4)
}
   0xc   :  { %s674_s15 = smov 64   ;;  %s675_s16 = smov 4  }
   0xd   :  { %22 = dma.hbm_to_vmem [thread:$0]  %s774_s0, 128, %s17_s13, [#allocation5], %s674_s15, %s674_s15, %s675_s16  }
   0xe   :  { %s676_s19 = smov [#allocation7]  }
   0xf   :  { %s28_s20 = sshll.u32 %s676_s19, 4  ;;  %s29_s20 = int_to_ptr.vmem [resolvable:$true] %s28_s20 }
  0x10   :  { %s635_s21 = scalar_lea.vmem %s29_s20, 256  ;;  %p640_p6 = scmp.lt.s32.totalorder %s29_s20, %s29_s20 }
  0x11   :  { %p636_p5 = scmp.ne.s32.totalorder %s29_s20, %s635_s21  ;;  %p641_p7 = scmp.lt.s32.totalorder %s635_s21, %s635_s21 }
  0x13   :  { %p642_p8 = por %p641_p7, %p640_p6 }
  0x15   :  { %p643_p9 = pnand %p642_p8, %p636_p5 }
  0x17   :  { %646 = shalt.err (!%p643_p9)
}
  0x18   :  { %34 = dma.hbm_to_vmem [thread:$0]  %s775_s1, 256, %s29_s20, [#allocation8], %s674_s15, %s674_s15, %s675_s16  }
  0x19   :  { %667 = dma.done.wait [#allocation5], 128  }
  0x1a   :  { %668 = vsyncadd [#allocation5], 4294967168 }
  0x1b   :  { %669 = dma.done.wait [#allocation8], 256  }
  0x1c   :  { %670 = vsyncadd [#allocation8], 4294967040  ;;  %v677_v0 = vmov 0.0   ;;  %vm678_vm0 = vmmov 0   ;;  %v596_v1 = vld [vmem:[#allocation7 + $0x8] sm:$0xff]   ;;  %v597_v2 = vld [vmem:[#allocation7] sm:$0xff]  }
  0x1d   :  { %543 = vmatprep.subr.bf16.mxu0 %v677_v0  ;;  %547 = vmatprep.mubr.msk.bf16.mxu0 %vm678_vm0, %v677_v0  ;;  %v598_v3 = vld [vmem:[#allocation4] sm:$0xff]   ;;  %vm74_vm1 = vcmask 261120   ;;  %v513_v4 = vld [vmem:[%s776_s2] ss:$0 sm:$0xff]  ;;  %vm127_vm2 = vcmask 257024   ;;  %s679_s24 = smov 96  }
  0x1e   :  { %551 = vmatprep.subr.bf16.mxu1 %v677_v0  ;;  %553 = vmatprep.mubr.msk.bf16.mxu1 %vm678_vm0, %v677_v0  ;;  %vm231_vm3 = vcmask 64512   ;;  %vm279_vm4 = vcmask 1043456   ;;  %vm130_vm5 = vcmask 57344   ;;  %s680_s2 = smov [#allocation9]   ;;  %vm492_vm6 = vcmask 1041409  }
  0x1f   :  { %544 = vmatpush3.bf16.msra.mxu0 %v596_v1  ;;  %131 = vst.msk [vmem:[#allocation3] sm:$0x1] %vm130_vm5, %v677_v0  ;;  %132 = vst.msk [vmem:[#allocation3 + $0x1] sm:$0x1] %vm130_vm5, %v677_v0  ;;  %s503_s25 = sshll.u32 %s680_s2, 4  ;;  %vm495_vm7 = vcmask 254976   ;;  %s504_s25 = int_to_ptr.vmem [resolvable:$true] %s503_s25 }
  0x20   :  { %545 = vmatprep.subr.bf16.mxu0 %v677_v0  ;;  %s647_s26 = scalar_lea.vmem %s504_s25, 32  ;;  %p652_p11 = scmp.lt.s32.totalorder %s504_s25, %s504_s25 }
  0x21   :  { %p648_p10 = scmp.ne.s32.totalorder %s504_s25, %s647_s26  ;;  %p653_p12 = scmp.lt.s32.totalorder %s647_s26, %s647_s26 }
  0x23   :  { %546 = vmatpush3.bf16.msra.mxu0 %v597_v2  ;;  %p654_p13 = por %p653_p12, %p652_p11 }
  0x24   :  { %557 = vmatprep.subr.bf16.mxu0 %v677_v0 }
  0x25   :  { %p655_p0 = pnand %p654_p13, %p648_p10 }
  0x26   :  { %548 = vmatmul.mubr.msk.bf16.vlgmr.msra.gmra.mxu0 %vm74_vm1, %v598_v3  ;;  %v254_v57 = vld [vmem:[#allocation3] sm:$0x1]  ;;  %v255_v61 = vld [vmem:[#allocation3 + $0x1] sm:$0x1] }
  0x27   :  { %559 = vmatprep.mubr.msk.bf16.mxu0 %vm678_vm0, %v677_v0 }
  0xe6   :  { %v112_v5 = vpop.f32.mrf.mxu0 }
  0xe7   :  { %v113_v6 = vadd.f32 %v513_v4, %v112_v5 }
  0xe8   :  { %v549_v7 = vpop.f32.mrf.mxu0 }
  0xe9   :  { %v725_v8 = vpack.c.bf16 %v113_v6, %v113_v6 }
  0xea   :  { %v115_v9 = vpop.f32.mrf.mxu0 }
  0xeb   :  { %128 = vst.msk [vmem:[#allocation2] sm:$0xf] %vm127_vm2, %v725_v8  ;;  %v116_v10 = vadd.f32 %v513_v4, %v115_v9  ;;  %135 = vrot.lane.b32.xlu0 %v725_v8, %s679_s24 }
  0xec   :  { %v550_v11 = vpop.f32.mrf.mxu0 }
  0xed   :  { %v729_v12 = vpack.c.bf16 %v116_v10, %v116_v10 }
  0xef   :  { %129 = vst.msk [vmem:[#allocation2 + $0x4] sm:$0xf] %vm127_vm2, %v729_v12  ;;  %183 = vrot.lane.b32.xlu0 %v729_v12, %s679_s24 }
  0xf2   :  { %v133_v17 = vld [vmem:[#allocation2] sm:$0xf] }
  0xf6   :  { %v134_v18 = vld [vmem:[#allocation2 + $0x4] sm:$0xf] }
 0x15d   :  { %v136_v13 = vpop.permute.xlu0 %135 }
 0x15e   :  { %v141_v14 = vsel %vm74_vm1, %v136_v13, 0 }
 0x15f   :  { %552 = vmatpush3.bf16.xpose.msra.mxu1 %v141_v14 }
 0x160   :  { %563 = vmatprep.subr.bf16.mxu1 %v677_v0 }
 0x161   :  { %v184_v15 = vpop.permute.xlu0 %183 }
 0x162   :  { %v189_v16 = vsel %vm74_vm1, %v184_v15, 0 }
 0x163   :  { %558 = vmatpush3.bf16.xpose.msra.mxu0 %v189_v16 }
 0x164   :  { %569 = vmatprep.subr.bf16.mxu0 %v677_v0 }
 0x166   :  { %554 = vmatmul.mubr.msk.bf16.vlgmr.msra.gmra.mxu1 %vm74_vm1, %v133_v17 }
 0x167   :  { %565 = vmatprep.mubr.msk.bf16.mxu1 %vm678_vm0, %v677_v0 }
 0x16a   :  { %560 = vmatmul.mubr.msk.bf16.vlgmr.msra.gmra.mxu0 %vm74_vm1, %v134_v18 }
 0x16b   :  { %571 = vmatprep.mubr.msk.bf16.mxu0 %vm678_vm0, %v677_v0 }
 0x226   :  { %v177_v19 = vpop.f32.mrf.mxu1 }
 0x227   :  { %v232_v20 = vsel %vm231_vm3, %v177_v19, -inf }
 0x228   :  { %233 = vmax.xlane.f32.xlu1 %v232_v20  ;;  %v555_v21 = vpop.f32.mrf.mxu1 }
 0x22a   :  { %v180_v22 = vpop.f32.mrf.mxu1  ;;  %v225_v23 = vpop.f32.mrf.mxu0 }
 0x22b   :  { %v235_v24 = vsel %vm231_vm3, %v225_v23, -inf }
 0x22c   :  { %v556_v25 = vpop.f32.mrf.mxu1  ;;  %236 = vmax.xlane.f32.xlu1 %v235_v24  ;;  %v561_v26 = vpop.f32.mrf.mxu0 }
 0x22e   :  { %v228_v27 = vpop.f32.mrf.mxu0 }
 0x230   :  { %v562_v28 = vpop.f32.mrf.mxu0 }
 0x2b1   :  { %v234_v29 = vpop.xlane.xlu1 %233 }
 0x2b2   :  { %v238_v30 = vsub.f32 %v177_v19, %v234_v29 }
 0x2b4   :  { %v240_v31 = vmul.f32 1.442695, %v238_v30 }
 0x2b5   :  { %v237_v32 = vpop.xlane.xlu1 %236 }
 0x2b6   :  { %599 = vpow2.f32 %v240_v31  ;;  %v239_v33 = vsub.f32 %v225_v23, %v237_v32 }
 0x2b8   :  { %v242_v34 = vmul.f32 1.442695, %v239_v33 }
 0x2ba   :  { %601 = vpow2.f32 %v242_v34 }
 0x2c3   :  { %v600_v35 = vpop.eup %599 }
 0x2c4   :  { %v244_v36 = vsel %vm231_vm3, %v600_v35, 0.0  ;;  %v258_v37 = vpack.c.bf16 %v600_v35, %v600_v35 }
 0x2c5   :  { %245 = vadd.xlane.f32.xlu0 %v244_v36 }
 0x2c6   :  { %v281_v38 = vsel %vm279_vm4, %v258_v37, 0 }
 0x2c7   :  { %v602_v39 = vpop.eup %601  ;;  %564 = vmatpush3.bf16.msra.mxu1 %v281_v38 }
 0x2c8   :  { %v247_v40 = vsel %vm231_vm3, %v602_v39, 0.0  ;;  %v259_v41 = vpack.c.bf16 %v602_v39, %v602_v39  ;;  %575 = vmatprep.subr.bf16.mxu1 %v677_v0 }
 0x2c9   :  { %248 = vadd.xlane.f32.xlu1 %v247_v40 }
 0x2ca   :  { %v343_v42 = vsel %vm279_vm4, %v259_v41, 0 }
 0x2cb   :  { %570 = vmatpush3.bf16.msra.mxu0 %v343_v42 }
 0x2cc   :  { %581 = vmatprep.subr.bf16.mxu0 %v677_v0 }
 0x34e   :  { %v246_v43 = vpop.xlane.xlu0 %245 }
 0x34f   :  { %603 = vrcp.f32 %v246_v43 }
 0x352   :  { %v249_v44 = vpop.xlane.xlu1 %248 }
 0x353   :  { %605 = vrcp.f32 %v249_v44 }
 0x35c   :  { %v604_v45 = vpop.eup %603 }
 0x35d   :  { %v252_v46 = vmul.f32 0.125, %v604_v45 }
 0x35f   :  { %v256_v47 = vpack.c.bf16 %v252_v46, %v252_v46 }
 0x360   :  { %v606_v48 = vpop.eup %605 }
 0x361   :  { %260 = vxpose.xlu1.c.b16.start.end [1/1] (short) (narrow) %v256_v47, 16  ;;  %v253_v49 = vmul.f32 0.125, %v606_v48 }
 0x363   :  { %v257_v50 = vpack.c.bf16 %v253_v49, %v253_v49 }
 0x365   :  { %393 = vrot.lane.b32.xlu1 %v725_v8, %s674_s15  ;;  %323 = vxpose.xlu0.c.b16.start.end [1/1] (short) (narrow) %v257_v50, 16 }
 0x369   :  { %441 = vrot.lane.b32.xlu1 %v729_v12, %s674_s15 }
 0x3c3   :  { %v268_v51 = vpop.trf.xlu1 }
 0x3c4   :  { %566 = vmatmul.mubr.msk.bf16.vlgmr.msra.gmra.mxu1 %vm231_vm3, %v268_v51 }
 0x3c5   :  { %577 = vmatprep.mubr.msk.bf16.mxu1 %vm678_vm0, %v677_v0 }
 0x3c7   :  { %v331_v52 = vpop.trf.xlu0 }
 0x3c8   :  { %572 = vmatmul.mubr.msk.bf16.vlgmr.msra.gmra.mxu0 %vm231_vm3, %v331_v52 }
 0x3c9   :  { %583 = vmatprep.mubr.msk.bf16.mxu0 %vm678_vm0, %v677_v0 }
 0x3d7   :  { %v394_v53 = vpop.permute.xlu1 %393 }
 0x3d8   :  { %v399_v54 = vsel %vm279_vm4, %v394_v53, 0 }
 0x3d9   :  { %576 = vmatpush3.bf16.msra.mxu1 %v399_v54 }
 0x3db   :  { %v442_v55 = vpop.permute.xlu1 %441 }
 0x3dc   :  { %v447_v56 = vsel %vm279_vm4, %v442_v55, 0 }
 0x3dd   :  { %582 = vmatpush3.bf16.msra.mxu0 %v447_v56 }
 0x484   :  { %v317_v58 = vpop.f32.mrf.mxu1 }
 0x485   :  { %v385_v59 = vadd.f32 %v317_v58, %v254_v57 }
 0x486   :  { %v567_v60 = vpop.f32.mrf.mxu1 }
 0x487   :  { %387 = vst.msk [vmem:[#allocation3] sm:$0x1] %vm130_vm5, %v385_v59 }
 0x488   :  { %v320_v62 = vpop.f32.mrf.mxu1  ;;  %v379_v63 = vpop.f32.mrf.mxu0 }
 0x489   :  { %v386_v1 = vadd.f32 %v379_v63, %v255_v61 }
 0x48a   :  { %v568_v2 = vpop.f32.mrf.mxu1  ;;  %v573_v0 = vpop.f32.mrf.mxu0 }
 0x48b   :  { %388 = vst.msk [vmem:[#allocation3 + $0x1] sm:$0x1] %vm130_vm5, %v386_v1 }
 0x48c   :  { %v382_v3 = vpop.f32.mrf.mxu0 }
 0x48e   :  { %v574_v4 = vpop.f32.mrf.mxu0  ;;  %v389_v5 = vld [vmem:[#allocation3] sm:$0x1] }
 0x48f   :  { %v391_v6 = vpack.c.bf16 %v389_v5, %v389_v5 }
 0x491   :  { %578 = vmatmul.mubr.msk.bf16.vlgmr.msra.gmra.mxu1 %vm231_vm3, %v391_v6 }
 0x492   :  { %v390_v7 = vld [vmem:[#allocation3 + $0x1] sm:$0x1] }
 0x493   :  { %v392_v8 = vpack.c.bf16 %v390_v7, %v390_v7 }
 0x495   :  { %584 = vmatmul.mubr.msk.bf16.vlgmr.msra.gmra.mxu0 %vm231_vm3, %v392_v8 }
 0x551   :  { %v435_v9 = vpop.f32.mrf.mxu1 }
 0x553   :  { %v579_v10 = vpop.f32.mrf.mxu1 }
 0x555   :  { %v438_v11 = vpop.f32.mrf.mxu1  ;;  %v483_v12 = vpop.f32.mrf.mxu0 }
 0x556   :  { %v491_v13 = vrot.slane %v483_v12, 7 }
 0x557   :  { %v580_v14 = vpop.f32.mrf.mxu1  ;;  %v585_v15 = vpop.f32.mrf.mxu0 }
 0x558   :  { %v493_v16 = vsel %vm492_vm6, %v491_v13, %v435_v9 }
 0x559   :  { %v486_v17 = vpop.f32.mrf.mxu0  ;;  %496 = vst.msk [vmem:[#allocation9] sm:$0x3] %vm495_vm7, %v493_v16 }
 0x55a   :  { %658 = shalt.err (!%p655_p0)
}
 0x55b   :  { %506 = dma.vmem_to_hbm [thread:$0]  %s504_s25, 32, %s777_s3, [#allocation6]   ;;  %v586_v18 = vpop.f32.mrf.mxu0 }
 0x55c   :  { %671 = dma.done.wait [#allocation6], 32  }
 0x55d   :  { %672 = vsyncadd [#allocation6], 4294967264 }
 0x55e   :  { %510 = vsyncpa [#allocation5], 1 }
 0x55f   :  { %511 = vsyncpa [#allocation8], 1 }
 0x560   :  { %512 = vsyncpa [#allocation6], 1 }

</bundles_post_ra>
